<compile_context>
chip_gen: v6e
topology: v6e:2x2x1
jax: 0.10.0
libtpu: 0.0.40
codegen_flags: <defaults>
</compile_context>

<pallas_src>
import functools

import jax
import jax.numpy as jnp
from jax.experimental import pallas as pl
from jax.experimental.pallas import tpu as pltpu


def fused_multi_conv1d_kernel(x_ref, *rest, n_layers, filter_sizes, in_offs,
                              valid_off, valid_len, lb):
    """Fused conv -> bias -> ReLU -> [residual] chain for one flattened block.

    refs layout:
      x_ref                 : (M, Cp)   M = batch_block * Lb, channels padded
      w_i, b_i (i=0..n-1)   : (K_i, Cp, Cp), (1, Cp)  per-tap weights / bias
      o_ref                 : (M, Cp)   valid rows per element: [valid_off, +L_out)
    """
    w_refs = rest[0:2 * n_layers:2]
    b_refs = rest[1:2 * n_layers:2]
    o_ref = rest[2 * n_layers]

    m, cp = x_ref.shape
    bn = m // lb

    # Element-local row index (3D sublane iota + layout-preserving collapse,
    # lb % 8 == 0).  Rows outside [valid_off, valid_off+valid_len) carry no
    # real activations between layers and are forced to zero, so the rolled
    # taps read zeros exactly where a zero-padded "same" conv would.
    row = jax.lax.broadcasted_iota(jnp.int32, (bn, lb, cp), 1).reshape(m, cp)
    keep = (row >= valid_off) & (row < valid_off + valid_len)

    def conv_layer(h, i):
        # K per-tap MXU matmuls accumulated in f32.  pltpu.roll is an XLU
        # sublane rotation: no unaligned sublane slices, no wide im2col temp.
        w = w_refs[i]
        acc = None
        for k in range(filter_sizes[i]):
            s = (in_offs[i] - k) % m
            hk = h if s == 0 else pltpu.roll(h, shift=s, axis=0)
            p = jnp.dot(hk, w[k], preferred_element_type=jnp.float32)
            acc = p if acc is None else acc + p
        return acc + b_refs[i][...]                  # bias broadcast (1, Cp)

    h = x_ref[...].astype(jnp.float32)               # whole batch block at once
    for i in range(n_layers - 1):
        a = jnp.maximum(conv_layer(h, i), 0.0)       # conv + bias + ReLU
        # TODO(synk): dropout == identity at inference.
        a = jnp.where(keep, a, 0.0)                  # keep zero-pad rows zero
        h = a + h if i > 0 else a                    # residual for i > 0
    out = conv_layer(h, n_layers - 1)                # last conv: no ReLU / res
    o_ref[...] = out.astype(o_ref.dtype)             # lane-dense full store


def multi_conv1d_forward(x_ncl, params_oik, filter_size_list, *,
                         batch_block=None):
    """Forward pass matching multi_Conv1d.forward (eval mode).

    x_ncl:       (N, C_in, L)   -- PyTorch NCL layout
    params_oik:  list of (w (C_out, C_in, K), b (C_out,)) per conv layer
    """
    N, C_in, L = x_ncl.shape
    n_layers = len(params_oik)
    assert n_layers == len(filter_size_list)

    filter_sizes = [int(k) for k in filter_size_list]
    pads = [0] + [(k - 1) // 2 for k in filter_sizes[1:]]

    # Per-layer output lengths (PyTorch Conv1d, stride 1, dilation 1).
    lengths = [L]
    for k, p in zip(filter_sizes, pads):
        lengths.append(lengths[-1] + 2 * p - k + 1)
    for i in range(1, n_layers - 1):   # residual adds need matching lengths
        assert lengths[i + 1] == lengths[i], "residual requires odd filter size"

    # Channel padding -> lane-dense (multiple of 128).
    c_max = max([C_in] + [int(w.shape[0]) for w, _ in params_oik])
    Cp = 128 * max(1, -(-c_max // 128))

    # Sequence buffer: 8-aligned, large enough that no rolled tap of a kept
    # output row leaves its element's window.
    off = max([0] + pads[1:])                        # row offset of activations
    valid_len = lengths[1] if n_layers > 1 else lengths[-1]
    need = max(L, off + valid_len)
    for i in range(1, n_layers):
        need = max(need, off + lengths[i + 1] + (filter_sizes[i] - 1 - pads[i]))
    Lb = -(-need // 8) * 8
    in_offs = tuple([off] + pads[1:])

    # Batch-flattening safety: every *kept* output row must only read rows in
    # its own element's [0, Lb) window, otherwise a roll would leak another
    # element's data into rows we keep.
    for i in range(n_layers):
        r_min = off - in_offs[i]
        r_max = off + lengths[i + 1] - 1 - in_offs[i] + filter_sizes[i] - 1
        assert 0 <= r_min and r_max < Lb, (
            "batch-flattened roll would cross an element boundary into kept rows")

    # ---- one-time host-side data prep (XLA ops, fused under jit) -----------
    x_nlc = jnp.transpose(x_ncl, (0, 2, 1)).astype(jnp.float32)   # NCL -> NLC
    x_nlc = jnp.pad(x_nlc, ((0, 0), (0, Lb - L), (0, Cp - C_in)))
    # TODO(synk): for large C_in / L the NCL->NLC transpose + channel pad could
    # move in-kernel to cut the Cp/C_in HBM read inflation; at this size the
    # whole padded input is ~N*Lb*Cp*4 bytes (tiny), so host prep is cheaper.

    w_list, b_list = [], []
    for (w, b), k in zip(params_oik, filter_sizes):
        c_out, c_in_l, _ = w.shape
        w_kic = jnp.transpose(w, (2, 1, 0)).astype(jnp.float32)   # (K, Cin, Cout)
        w_kic = jnp.pad(w_kic, ((0, 0), (0, Cp - c_in_l), (0, Cp - c_out)))
        w_list.append(w_kic)                                      # (K, Cp, Cp)
        b_list.append(jnp.pad(b.astype(jnp.float32),
                              (0, Cp - c_out)).reshape(1, Cp))

    # Batch blocking: target M = batch_block*Lb ~ 256 MXU rows, but keep >= 2
    # grid steps when N allows so the "parallel" axis can use both v7x TCs.
    if batch_block is None:
        bb = max(1, 256 // Lb)
        if N >= 2:
            bb = min(bb, max(1, N // 2))
        batch_block = max(1, min(bb, N))
    N_pad = -(-N // batch_block) * batch_block
    if N_pad != N:
        x_nlc = jnp.pad(x_nlc, ((0, N_pad - N), (0, 0), (0, 0)))
    block_rows = batch_block * Lb
    x_flat = x_nlc.reshape(N_pad * Lb, Cp)            # flattened (rows, lanes)

    kernel = functools.partial(
        fused_multi_conv1d_kernel,
        n_layers=n_layers, filter_sizes=tuple(filter_sizes),
        in_offs=in_offs, valid_off=off, valid_len=valid_len, lb=Lb)

    in_specs = [pl.BlockSpec((block_rows, Cp), lambda n: (n, 0))]
    args = [x_flat]
    const_mode = pl.Buffered(1)        # grid-invariant weights: single buffer
    for w3, b2 in zip(w_list, b_list):
        in_specs.append(pl.BlockSpec((w3.shape[0], Cp, Cp),
                                     lambda n: (0, 0, 0),
                                     pipeline_mode=const_mode))
        in_specs.append(pl.BlockSpec((1, Cp), lambda n: (0, 0),
                                     pipeline_mode=const_mode))
        args.extend([w3, b2])

    # Explicit VMEM budget (in/out double-buffered, constants single-buffered);
    # stays far under v7x's 64 MiB.  TODO(synk): for long L add an L-tiling
    # grid axis with (K-1)-row halos instead of growing Lb.
    io_bytes = 2 * 2 * block_rows * Cp * 4
    w_bytes = sum(int(w3.size) for w3 in w_list) * 4
    b_bytes = n_layers * Cp * 4
    vmem_limit = int(min(64 << 20,
                         max(2 * (io_bytes + w_bytes + b_bytes), 16 << 20)))

    out = pl.pallas_call(
        kernel,
        out_shape=jax.ShapeDtypeStruct((N_pad * Lb, Cp), jnp.float32),
        grid=(N_pad // batch_block,),
        in_specs=in_specs,
        out_specs=pl.BlockSpec((block_rows, Cp), lambda n: (n, 0)),
        compiler_params=pltpu.CompilerParams(
            dimension_semantics=("parallel",),
            vmem_limit_bytes=vmem_limit),
    )(*args)

    # Crop (required: rows/channels outside hold padding & wrapped-roll junk),
    # then back to the module's NCL layout.
    c_out_last = int(params_oik[-1][0].shape[0])
    L_final = lengths[-1]
    out = out.reshape(N_pad, Lb, Cp)[:N, off:off + L_final, :c_out_last]
    return jnp.transpose(out, (0, 2, 1))              # NLC -> NCL


# ---------------- reference (plain JAX / XLA) for correctness check ----------

def _conv1d_ref(x_ncl, w_oik, b, pad):
    out = jax.lax.conv_general_dilated(
        x_ncl, w_oik, window_strides=(1,), padding=[(pad, pad)],
        dimension_numbers=("NCH", "OIH", "NCH"))
    return out + b[None, :, None]


def _multi_conv1d_ref(x_ncl, params_oik, filter_size_list):
    out = x_ncl
    n_layers = len(params_oik)
    for i in range(n_layers - 1):
        prev = out
        pad = 0 if i == 0 else (filter_size_list[i] - 1) // 2
        out = _conv1d_ref(out, params_oik[i][0], params_oik[i][1], pad)
        out = jnp.maximum(out, 0.0)
        if i > 0:
            out = out + prev
    pad = (filter_size_list[-1] - 1) // 2
    return _conv1d_ref(out, params_oik[-1][0], params_oik[-1][1], pad)


if __name__ == "__main__":
    # Module configuration (synthetic, deterministic)
    N, C_in, L = 2, 4, 16
    filter_num_list = [32, 32, 32, 8]
    filter_size_list = [3, 3, 3, 3]
    # dropout = 0.1  -> identity at inference

    key = jax.random.PRNGKey(0)
    keys = jax.random.split(key, 2 * len(filter_num_list) + 1)

    x = jax.random.normal(keys[0], (N, C_in, L), jnp.float32)

    # PyTorch-shaped weights: (C_out, C_in, K); bias: (C_out,)
    params_oik = []
    c_prev = C_in
    for i, (c_out, k) in enumerate(zip(filter_num_list, filter_size_list)):
        w = jax.random.normal(keys[1 + 2 * i], (c_out, c_prev, k),
                              jnp.float32) * 0.1
        b = jax.random.normal(keys[2 + 2 * i], (c_out,), jnp.float32) * 0.1
        params_oik.append((w, b))
        c_prev = c_out

    fwd = jax.jit(lambda xx, pp: multi_conv1d_forward(xx, pp, filter_size_list))
    out = jax.block_until_ready(fwd(x, params_oik))

    ref = jax.block_until_ready(_multi_conv1d_ref(x, params_oik,
                                                  filter_size_list))

    assert out.shape == ref.shape, (out.shape, ref.shape)
    assert jnp.allclose(out, ref, atol=1e-4, rtol=1e-4), (
        "mismatch vs reference, max abs err = %g"
        % float(jnp.max(jnp.abs(out - ref))))

    print("KERNEL_OK")
</pallas_src>

<mosaic_0001>
module attributes {stable_mosaic.version = 11 : i64} {
  func.func @fused_multi_conv1d_kernel(%arg0: i32, %arg1: memref<16x128xf32, #tpu.memory_space<vmem>>, %arg2: memref<3x128x128xf32, #tpu.memory_space<vmem>>, %arg3: memref<1x128xf32, #tpu.memory_space<vmem>>, %arg4: memref<3x128x128xf32, #tpu.memory_space<vmem>>, %arg5: memref<1x128xf32, #tpu.memory_space<vmem>>, %arg6: memref<3x128x128xf32, #tpu.memory_space<vmem>>, %arg7: memref<1x128xf32, #tpu.memory_space<vmem>>, %arg8: memref<3x128x128xf32, #tpu.memory_space<vmem>>, %arg9: memref<1x128xf32, #tpu.memory_space<vmem>>, %arg10: memref<16x128xf32, #tpu.memory_space<vmem>>) attributes {dimension_semantics = [#tpu.dimension_semantics<parallel>], iteration_bounds = array<i64: 2>, scalar_prefetch = 0 : i64, scratch_operands = 0 : i64, tpu.core_type = #tpu.core_type<tc>, window_params = [{transform_indices = @transform_0, window_bounds = array<i64: 16, 128>}, {pipeline_mode = #tpu.pipeline_mode<synchronous>, transform_indices = @transform_1, window_bounds = array<i64: 3, 128, 128>}, {pipeline_mode = #tpu.pipeline_mode<synchronous>, transform_indices = @transform_2, window_bounds = array<i64: 1, 128>}, {pipeline_mode = #tpu.pipeline_mode<synchronous>, transform_indices = @transform_3, window_bounds = array<i64: 3, 128, 128>}, {pipeline_mode = #tpu.pipeline_mode<synchronous>, transform_indices = @transform_4, window_bounds = array<i64: 1, 128>}, {pipeline_mode = #tpu.pipeline_mode<synchronous>, transform_indices = @transform_5, window_bounds = array<i64: 3, 128, 128>}, {pipeline_mode = #tpu.pipeline_mode<synchronous>, transform_indices = @transform_6, window_bounds = array<i64: 1, 128>}, {pipeline_mode = #tpu.pipeline_mode<synchronous>, transform_indices = @transform_7, window_bounds = array<i64: 3, 128, 128>}, {pipeline_mode = #tpu.pipeline_mode<synchronous>, transform_indices = @transform_8, window_bounds = array<i64: 1, 128>}, {transform_indices = @transform_9, window_bounds = array<i64: 16, 128>}]} {
    %0 = tpu.iota {dimensions = array<i32: 1>} : vector<1x16x128xi32>
    %1 = vector.shape_cast %0 : vector<1x16x128xi32> to vector<16x128xi32>
    %c1_i32 = arith.constant 1 : i32
    %2 = vector.broadcast %c1_i32 : i32 to vector<16x128xi32>
    %3 = arith.cmpi sge, %1, %2 : vector<16x128xi32>
    %c15_i32 = arith.constant 15 : i32
    %4 = vector.broadcast %c15_i32 : i32 to vector<16x128xi32>
    %5 = arith.cmpi slt, %1, %4 : vector<16x128xi32>
    %6 = arith.andi %3, %5 : vector<16x128xi1>
    %c0 = arith.constant 0 : index
    %c0_0 = arith.constant 0 : index
    %7 = vector.load %arg1[%c0, %c0_0] : memref<16x128xf32, #tpu.memory_space<vmem>>, vector<16x128xf32>
    %c1_i32_1 = arith.constant 1 : i32
    %8 = tpu.dynamic_rotate %7 by %c1_i32_1 dim 0 : vector<16x128xf32>, i32 -> vector<16x128xf32>
    %c0_2 = arith.constant 0 : index
    %c0_3 = arith.constant 0 : index
    %c0_4 = arith.constant 0 : index
    %9 = vector.load %arg2[%c0_2, %c0_3, %c0_4] : memref<3x128x128xf32, #tpu.memory_space<vmem>>, vector<1x128x128xf32>
    %10 = vector.shape_cast %9 : vector<1x128x128xf32> to vector<128x128xf32>
    %cst = arith.constant dense<0.000000e+00> : vector<16x128xf32>
    %11 = tpu.matmul %8, %10, %cst {dimension_numbers = #tpu.dot_dimension_numbers<[1], [0], [0], [1], [0, 0, 1, 1], [], []>} : vector<16x128xf32>, vector<128x128xf32>, vector<16x128xf32> -> vector<16x128xf32>
    %c1 = arith.constant 1 : index
    %c0_5 = arith.constant 0 : index
    %c0_6 = arith.constant 0 : index
    %12 = vector.load %arg2[%c1, %c0_5, %c0_6] : memref<3x128x128xf32, #tpu.memory_space<vmem>>, vector<1x128x128xf32>
    %13 = vector.shape_cast %12 : vector<1x128x128xf32> to vector<128x128xf32>
    %cst_7 = arith.constant dense<0.000000e+00> : vector<16x128xf32>
    %14 = tpu.matmul %7, %13, %cst_7 {dimension_numbers = #tpu.dot_dimension_numbers<[1], [0], [0], [1], [0, 0, 1, 1], [], []>} : vector<16x128xf32>, vector<128x128xf32>, vector<16x128xf32> -> vector<16x128xf32>
    %15 = arith.addf %11, %14 : vector<16x128xf32>
    %c15_i32_8 = arith.constant 15 : i32
    %16 = tpu.dynamic_rotate %7 by %c15_i32_8 dim 0 : vector<16x128xf32>, i32 -> vector<16x128xf32>
    %c2 = arith.constant 2 : index
    %c0_9 = arith.constant 0 : index
    %c0_10 = arith.constant 0 : index
    %17 = vector.load %arg2[%c2, %c0_9, %c0_10] : memref<3x128x128xf32, #tpu.memory_space<vmem>>, vector<1x128x128xf32>
    %18 = vector.shape_cast %17 : vector<1x128x128xf32> to vector<128x128xf32>
    %cst_11 = arith.constant dense<0.000000e+00> : vector<16x128xf32>
    %19 = tpu.matmul %16, %18, %cst_11 {dimension_numbers = #tpu.dot_dimension_numbers<[1], [0], [0], [1], [0, 0, 1, 1], [], []>} : vector<16x128xf32>, vector<128x128xf32>, vector<16x128xf32> -> vector<16x128xf32>
    %20 = arith.addf %15, %19 : vector<16x128xf32>
    %c0_12 = arith.constant 0 : index
    %c0_13 = arith.constant 0 : index
    %21 = vector.load %arg3[%c0_12, %c0_13] : memref<1x128xf32, #tpu.memory_space<vmem>>, vector<1x128xf32>
    %22 = vector.broadcast %21 : vector<1x128xf32> to vector<16x128xf32>
    %23 = arith.addf %20, %22 : vector<16x128xf32>
    %cst_14 = arith.constant 0.000000e+00 : f32
    %24 = vector.broadcast %cst_14 : f32 to vector<16x128xf32>
    %25 = arith.maximumf %23, %24 : vector<16x128xf32>
    %cst_15 = arith.constant 0.000000e+00 : f32
    %26 = vector.broadcast %cst_15 : f32 to vector<16x128xf32>
    %27 = arith.select %6, %25, %26 : vector<16x128xi1>, vector<16x128xf32>
    %c1_i32_16 = arith.constant 1 : i32
    %28 = tpu.dynamic_rotate %27 by %c1_i32_16 dim 0 : vector<16x128xf32>, i32 -> vector<16x128xf32>
    %c0_17 = arith.constant 0 : index
    %c0_18 = arith.constant 0 : index
    %c0_19 = arith.constant 0 : index
    %29 = vector.load %arg4[%c0_17, %c0_18, %c0_19] : memref<3x128x128xf32, #tpu.memory_space<vmem>>, vector<1x128x128xf32>
    %30 = vector.shape_cast %29 : vector<1x128x128xf32> to vector<128x128xf32>
    %cst_20 = arith.constant dense<0.000000e+00> : vector<16x128xf32>
    %31 = tpu.matmul %28, %30, %cst_20 {dimension_numbers = #tpu.dot_dimension_numbers<[1], [0], [0], [1], [0, 0, 1, 1], [], []>} : vector<16x128xf32>, vector<128x128xf32>, vector<16x128xf32> -> vector<16x128xf32>
    %c1_21 = arith.constant 1 : index
    %c0_22 = arith.constant 0 : index
    %c0_23 = arith.constant 0 : index
    %32 = vector.load %arg4[%c1_21, %c0_22, %c0_23] : memref<3x128x128xf32, #tpu.memory_space<vmem>>, vector<1x128x128xf32>
    %33 = vector.shape_cast %32 : vector<1x128x128xf32> to vector<128x128xf32>
    %cst_24 = arith.constant dense<0.000000e+00> : vector<16x128xf32>
    %34 = tpu.matmul %27, %33, %cst_24 {dimension_numbers = #tpu.dot_dimension_numbers<[1], [0], [0], [1], [0, 0, 1, 1], [], []>} : vector<16x128xf32>, vector<128x128xf32>, vector<16x128xf32> -> vector<16x128xf32>
    %35 = arith.addf %31, %34 : vector<16x128xf32>
    %c15_i32_25 = arith.constant 15 : i32
    %36 = tpu.dynamic_rotate %27 by %c15_i32_25 dim 0 : vector<16x128xf32>, i32 -> vector<16x128xf32>
    %c2_26 = arith.constant 2 : index
    %c0_27 = arith.constant 0 : index
    %c0_28 = arith.constant 0 : index
    %37 = vector.load %arg4[%c2_26, %c0_27, %c0_28] : memref<3x128x128xf32, #tpu.memory_space<vmem>>, vector<1x128x128xf32>
    %38 = vector.shape_cast %37 : vector<1x128x128xf32> to vector<128x128xf32>
    %cst_29 = arith.constant dense<0.000000e+00> : vector<16x128xf32>
    %39 = tpu.matmul %36, %38, %cst_29 {dimension_numbers = #tpu.dot_dimension_numbers<[1], [0], [0], [1], [0, 0, 1, 1], [], []>} : vector<16x128xf32>, vector<128x128xf32>, vector<16x128xf32> -> vector<16x128xf32>
    %40 = arith.addf %35, %39 : vector<16x128xf32>
    %c0_30 = arith.constant 0 : index
    %c0_31 = arith.constant 0 : index
    %41 = vector.load %arg5[%c0_30, %c0_31] : memref<1x128xf32, #tpu.memory_space<vmem>>, vector<1x128xf32>
    %42 = vector.broadcast %41 : vector<1x128xf32> to vector<16x128xf32>
    %43 = arith.addf %40, %42 : vector<16x128xf32>
    %cst_32 = arith.constant 0.000000e+00 : f32
    %44 = vector.broadcast %cst_32 : f32 to vector<16x128xf32>
    %45 = arith.maximumf %43, %44 : vector<16x128xf32>
    %cst_33 = arith.constant 0.000000e+00 : f32
    %46 = vector.broadcast %cst_33 : f32 to vector<16x128xf32>
    %47 = arith.select %6, %45, %46 : vector<16x128xi1>, vector<16x128xf32>
    %48 = arith.addf %47, %27 : vector<16x128xf32>
    %c1_i32_34 = arith.constant 1 : i32
    %49 = tpu.dynamic_rotate %48 by %c1_i32_34 dim 0 : vector<16x128xf32>, i32 -> vector<16x128xf32>
    %c0_35 = arith.constant 0 : index
    %c0_36 = arith.constant 0 : index
    %c0_37 = arith.constant 0 : index
    %50 = vector.load %arg6[%c0_35, %c0_36, %c0_37] : memref<3x128x128xf32, #tpu.memory_space<vmem>>, vector<1x128x128xf32>
    %51 = vector.shape_cast %50 : vector<1x128x128xf32> to vector<128x128xf32>
    %cst_38 = arith.constant dense<0.000000e+00> : vector<16x128xf32>
    %52 = tpu.matmul %49, %51, %cst_38 {dimension_numbers = #tpu.dot_dimension_numbers<[1], [0], [0], [1], [0, 0, 1, 1], [], []>} : vector<16x128xf32>, vector<128x128xf32>, vector<16x128xf32> -> vector<16x128xf32>
    %c1_39 = arith.constant 1 : index
    %c0_40 = arith.constant 0 : index
    %c0_41 = arith.constant 0 : index
    %53 = vector.load %arg6[%c1_39, %c0_40, %c0_41] : memref<3x128x128xf32, #tpu.memory_space<vmem>>, vector<1x128x128xf32>
    %54 = vector.shape_cast %53 : vector<1x128x128xf32> to vector<128x128xf32>
    %cst_42 = arith.constant dense<0.000000e+00> : vector<16x128xf32>
    %55 = tpu.matmul %48, %54, %cst_42 {dimension_numbers = #tpu.dot_dimension_numbers<[1], [0], [0], [1], [0, 0, 1, 1], [], []>} : vector<16x128xf32>, vector<128x128xf32>, vector<16x128xf32> -> vector<16x128xf32>
    %56 = arith.addf %52, %55 : vector<16x128xf32>
    %c15_i32_43 = arith.constant 15 : i32
    %57 = tpu.dynamic_rotate %48 by %c15_i32_43 dim 0 : vector<16x128xf32>, i32 -> vector<16x128xf32>
    %c2_44 = arith.constant 2 : index
    %c0_45 = arith.constant 0 : index
    %c0_46 = arith.constant 0 : index
    %58 = vector.load %arg6[%c2_44, %c0_45, %c0_46] : memref<3x128x128xf32, #tpu.memory_space<vmem>>, vector<1x128x128xf32>
    %59 = vector.shape_cast %58 : vector<1x128x128xf32> to vector<128x128xf32>
    %cst_47 = arith.constant dense<0.000000e+00> : vector<16x128xf32>
    %60 = tpu.matmul %57, %59, %cst_47 {dimension_numbers = #tpu.dot_dimension_numbers<[1], [0], [0], [1], [0, 0, 1, 1], [], []>} : vector<16x128xf32>, vector<128x128xf32>, vector<16x128xf32> -> vector<16x128xf32>
    %61 = arith.addf %56, %60 : vector<16x128xf32>
    %c0_48 = arith.constant 0 : index
    %c0_49 = arith.constant 0 : index
    %62 = vector.load %arg7[%c0_48, %c0_49] : memref<1x128xf32, #tpu.memory_space<vmem>>, vector<1x128xf32>
    %63 = vector.broadcast %62 : vector<1x128xf32> to vector<16x128xf32>
    %64 = arith.addf %61, %63 : vector<16x128xf32>
    %cst_50 = arith.constant 0.000000e+00 : f32
    %65 = vector.broadcast %cst_50 : f32 to vector<16x128xf32>
    %66 = arith.maximumf %64, %65 : vector<16x128xf32>
    %cst_51 = arith.constant 0.000000e+00 : f32
    %67 = vector.broadcast %cst_51 : f32 to vector<16x128xf32>
    %68 = arith.select %6, %66, %67 : vector<16x128xi1>, vector<16x128xf32>
    %69 = arith.addf %68, %48 : vector<16x128xf32>
    %c1_i32_52 = arith.constant 1 : i32
    %70 = tpu.dynamic_rotate %69 by %c1_i32_52 dim 0 : vector<16x128xf32>, i32 -> vector<16x128xf32>
    %c0_53 = arith.constant 0 : index
    %c0_54 = arith.constant 0 : index
    %c0_55 = arith.constant 0 : index
    %71 = vector.load %arg8[%c0_53, %c0_54, %c0_55] : memref<3x128x128xf32, #tpu.memory_space<vmem>>, vector<1x128x128xf32>
    %72 = vector.shape_cast %71 : vector<1x128x128xf32> to vector<128x128xf32>
    %cst_56 = arith.constant dense<0.000000e+00> : vector<16x128xf32>
    %73 = tpu.matmul %70, %72, %cst_56 {dimension_numbers = #tpu.dot_dimension_numbers<[1], [0], [0], [1], [0, 0, 1, 1], [], []>} : vector<16x128xf32>, vector<128x128xf32>, vector<16x128xf32> -> vector<16x128xf32>
    %c1_57 = arith.constant 1 : index
    %c0_58 = arith.constant 0 : index
    %c0_59 = arith.constant 0 : index
    %74 = vector.load %arg8[%c1_57, %c0_58, %c0_59] : memref<3x128x128xf32, #tpu.memory_space<vmem>>, vector<1x128x128xf32>
    %75 = vector.shape_cast %74 : vector<1x128x128xf32> to vector<128x128xf32>
    %cst_60 = arith.constant dense<0.000000e+00> : vector<16x128xf32>
    %76 = tpu.matmul %69, %75, %cst_60 {dimension_numbers = #tpu.dot_dimension_numbers<[1], [0], [0], [1], [0, 0, 1, 1], [], []>} : vector<16x128xf32>, vector<128x128xf32>, vector<16x128xf32> -> vector<16x128xf32>
    %77 = arith.addf %73, %76 : vector<16x128xf32>
    %c15_i32_61 = arith.constant 15 : i32
    %78 = tpu.dynamic_rotate %69 by %c15_i32_61 dim 0 : vector<16x128xf32>, i32 -> vector<16x128xf32>
    %c2_62 = arith.constant 2 : index
    %c0_63 = arith.constant 0 : index
    %c0_64 = arith.constant 0 : index
    %79 = vector.load %arg8[%c2_62, %c0_63, %c0_64] : memref<3x128x128xf32, #tpu.memory_space<vmem>>, vector<1x128x128xf32>
    %80 = vector.shape_cast %79 : vector<1x128x128xf32> to vector<128x128xf32>
    %cst_65 = arith.constant dense<0.000000e+00> : vector<16x128xf32>
    %81 = tpu.matmul %78, %80, %cst_65 {dimension_numbers = #tpu.dot_dimension_numbers<[1], [0], [0], [1], [0, 0, 1, 1], [], []>} : vector<16x128xf32>, vector<128x128xf32>, vector<16x128xf32> -> vector<16x128xf32>
    %82 = arith.addf %77, %81 : vector<16x128xf32>
    %c0_66 = arith.constant 0 : index
    %c0_67 = arith.constant 0 : index
    %83 = vector.load %arg9[%c0_66, %c0_67] : memref<1x128xf32, #tpu.memory_space<vmem>>, vector<1x128xf32>
    %84 = vector.broadcast %83 : vector<1x128xf32> to vector<16x128xf32>
    %85 = arith.addf %82, %84 : vector<16x128xf32>
    %c0_68 = arith.constant 0 : index
    %c0_69 = arith.constant 0 : index
    %86 = vector.load %arg10[%c0_68, %c0_69] : memref<16x128xf32, #tpu.memory_space<vmem>>, vector<16x128xf32>
    tpu.vector_store %arg10[%c0_68, %c0_69], %85 {strides = array<i32>} : memref<16x128xf32, #tpu.memory_space<vmem>>, vector<16x128xf32>,
    return
  }
  func.func @transform_0(%arg0: i32) -> (i32, i32) {
    %c0_i32 = arith.constant 0 : i32
    %c0_i32_0 = arith.constant 0 : i32
    return %arg0, %c0_i32 : i32, i32
  }
  func.func @transform_1(%arg0: i32) -> (i32, i32, i32) {
    %c0_i32 = arith.constant 0 : i32
    %c0_i32_0 = arith.constant 0 : i32
    %c0_i32_1 = arith.constant 0 : i32
    %c0_i32_2 = arith.constant 0 : i32
    return %c0_i32, %c0_i32_0, %c0_i32_1 : i32, i32, i32
  }
  func.func @transform_2(%arg0: i32) -> (i32, i32) {
    %c0_i32 = arith.constant 0 : i32
    %c0_i32_0 = arith.constant 0 : i32
    %c0_i32_1 = arith.constant 0 : i32
    return %c0_i32, %c0_i32_0 : i32, i32
  }
  func.func @transform_3(%arg0: i32) -> (i32, i32, i32) {
    %c0_i32 = arith.constant 0 : i32
    %c0_i32_0 = arith.constant 0 : i32
    %c0_i32_1 = arith.constant 0 : i32
    %c0_i32_2 = arith.constant 0 : i32
    return %c0_i32, %c0_i32_0, %c0_i32_1 : i32, i32, i32
  }
  func.func @transform_4(%arg0: i32) -> (i32, i32) {
    %c0_i32 = arith.constant 0 : i32
    %c0_i32_0 = arith.constant 0 : i32
    %c0_i32_1 = arith.constant 0 : i32
    return %c0_i32, %c0_i32_0 : i32, i32
  }
  func.func @transform_5(%arg0: i32) -> (i32, i32, i32) {
    %c0_i32 = arith.constant 0 : i32
    %c0_i32_0 = arith.constant 0 : i32
    %c0_i32_1 = arith.constant 0 : i32
    %c0_i32_2 = arith.constant 0 : i32
    return %c0_i32, %c0_i32_0, %c0_i32_1 : i32, i32, i32
  }
  func.func @transform_6(%arg0: i32) -> (i32, i32) {
    %c0_i32 = arith.constant 0 : i32
    %c0_i32_0 = arith.constant 0 : i32
    %c0_i32_1 = arith.constant 0 : i32
    return %c0_i32, %c0_i32_0 : i32, i32
  }
  func.func @transform_7(%arg0: i32) -> (i32, i32, i32) {
    %c0_i32 = arith.constant 0 : i32
    %c0_i32_0 = arith.constant 0 : i32
    %c0_i32_1 = arith.constant 0 : i32
    %c0_i32_2 = arith.constant 0 : i32
    return %c0_i32, %c0_i32_0, %c0_i32_1 : i32, i32, i32
  }
  func.func @transform_8(%arg0: i32) -> (i32, i32) {
    %c0_i32 = arith.constant 0 : i32
    %c0_i32_0 = arith.constant 0 : i32
    %c0_i32_1 = arith.constant 0 : i32
    return %c0_i32, %c0_i32_0 : i32, i32
  }
  func.func @transform_9(%arg0: i32) -> (i32, i32) {
    %c0_i32 = arith.constant 0 : i32
    %c0_i32_0 = arith.constant 0 : i32
    return %arg0, %c0_i32 : i32, i32
  }
}

</mosaic_0001>

<bundles_post_ra>
// kernel: _lambda_.1
= control target key start
LH: loop header
LB: loop body
LE: loop exit
PB: predicated region body
PF: predicated region fallthrough
CT: control target
= control target key end

     0   :  { %s2446_s30 = smov 0   ;;  %s3160_s0 = inlined_call_operand.vmem [shape: f32[32,128], index: 0, kind: input, shape index: {}]   ;;  %s3161_s1 = inlined_call_operand.vmem [shape: f32[3,128,128], index: 1, kind: input, shape index: {}]   ;;  %s3162_s2 = inlined_call_operand.vmem [shape: f32[1,128], index: 2, kind: input, shape index: {}]   ;;  %s3163_s3 = inlined_call_operand.vmem [shape: f32[3,128,128], index: 3, kind: input, shape index: {}]   ;;  %s3164_s4 = inlined_call_operand.vmem [shape: f32[1,128], index: 4, kind: input, shape index: {}]   ;;  %s3165_s5 = inlined_call_operand.vmem [shape: f32[3,128,128], index: 5, kind: input, shape index: {}]   ;;  %s3166_s6 = inlined_call_operand.vmem [shape: f32[1,128], index: 6, kind: input, shape index: {}]   ;;  %s3167_s7 = inlined_call_operand.vmem [shape: f32[3,128,128], index: 7, kind: input, shape index: {}]   ;;  %s3168_s8 = inlined_call_operand.vmem [shape: f32[1,128], index: 8, kind: input, shape index: {}]   ;;  %s3169_s9 = inlined_call_operand.vmem [shape: f32[32,128], index: 9, kind: output, shape index: {}]  }
   0x1 LB: > { %s1599_s10 = sadd.s32 4294967295, %s2394_s30   ;;  %p1603_p0 = scmp.ge.s32.totalorder %s2394_s30, 1  ;;  %s2394_s30 = sphi %s2446_s30, %s19_s30  }
   0x2   : > { %p288_p1 = scmp.lt.s32.totalorder %s2394_s30, 3 }
   0x4   : > { %p289_p2 = pnand %p1603_p0, %p288_p1 }
   0x5   : > { %s1604_s12 = sshll.u32 (!%p289_p2), %s1599_s10, 1 }
   0x6   : > { %292 = sbr.rel (%p289_p2) target bundleno = 986 (0x3da), region = 56  ;;  %p325_p3 = scmp.lt.s32.totalorder (!%p289_p2), %s1604_s12, 3 }
   0xb   : > { %v1623_v0 = vld [vmem:[%s3161_s1 + $0xf8] sm:$0xff]  ;;  %v1622_v2 = vld [vmem:[%s3161_s1 + $0xf0] sm:$0xff]  ;;  %v1621_v4 = vld [vmem:[%s3161_s1 + $0xe8] sm:$0xff]  ;;  %s3171_s12 = smov (!%p325_p3, %s1604_s12), 3  ;;  %v336_v22 = vlaneseq }
   0xc   : > { %v367_v1 = vld [vmem:[%s3161_s1 + $0x78] sm:$0xff]  ;;  %1960 = vmatprep.subr.mxu0 %v1623_v0  ;;  %v366_v3 = vld [vmem:[%s3161_s1 + $0x70] sm:$0xff]  ;;  %v365_v5 = vld [vmem:[%s3161_s1 + $0x68] sm:$0xff]  ;;  %s1605_s14 = sshll.u32 %s3171_s12, 3 }
   0xd   : > { %1995 = vmatprep.subr.mxu1 %v367_v1  ;;  %1961 = vmatpush3.msra.mxu0 %v1623_v0  ;;  %v1620_v6 = vld [vmem:[%s3161_s1 + $0xe0] sm:$0xff]  ;;  %v1619_v8 = vld [vmem:[%s3161_s1 + $0xd8] sm:$0xff]  ;;  %v1618_v10 = vld [vmem:[%s3161_s1 + $0xd0] sm:$0xff]  ;;  %s328_s24 = scalar_lea.vmem %s3160_s0, %s1605_s14  ;;  %v2544_v29 = vshrl.u32 %v336_v22, 7  ;;  %s334_s29 = scalar_lea.vmem %s3169_s9, %s1605_s14 }
   0xe   : > { %1996 = vmatpush3.msra.mxu1 %v367_v1  ;;  %1962 = vmatprep.subr.mxu0 %v1622_v2  ;;  %v364_v7 = vld [vmem:[%s3161_s1 + $0x60] sm:$0xff]  ;;  %v363_v9 = vld [vmem:[%s3161_s1 + $0x58] sm:$0xff]  ;;  %v362_v11 = vld [vmem:[%s3161_s1 + $0x50] sm:$0xff] }
   0xf   : > { %1997 = vmatprep.subr.mxu1 %v366_v3  ;;  %1963 = vmatpush3.msra.mxu0 %v1622_v2  ;;  %v1617_v12 = vld [vmem:[%s3161_s1 + $0xc8] sm:$0xff]  ;;  %v1616_v14 = vld [vmem:[%s3161_s1 + $0xc0] sm:$0xff]  ;;  %v1615_v16 = vld [vmem:[%s3161_s1 + $0xb8] sm:$0xff]  ;;  %vm349_vm0 = vcmp.lt.s32.totalorder %v2544_v29, 1  ;;  %vm537_vm1 = vcmp.lt.s32.totalorder %v2544_v29, 7  ;;  %vm339_vm3 = vcmp.ge.s32.totalorder %v2544_v29, 1 }
  0x10   : > { %1998 = vmatpush3.msra.mxu1 %v366_v3  ;;  %1964 = vmatprep.subr.mxu0 %v1621_v4  ;;  %v361_v13 = vld [vmem:[%s3161_s1 + $0x48] sm:$0xff]  ;;  %v360_v15 = vld [vmem:[%s3161_s1 + $0x40] sm:$0xff]  ;;  %v359_v17 = vld [vmem:[%s3161_s1 + $0x38] sm:$0xff] }
  0x11   : > { %1999 = vmatprep.subr.mxu1 %v365_v5  ;;  %1965 = vmatpush3.msra.mxu0 %v1621_v4  ;;  %v1614_v18 = vld [vmem:[%s3161_s1 + $0xb0] sm:$0xff]  ;;  %v1613_v20 = vld [vmem:[%s3161_s1 + $0xa8] sm:$0xff]  ;;  %v1612_v23 = vld [vmem:[%s3161_s1 + $0xa0] sm:$0xff] }
  0x12   : > { %2000 = vmatpush3.msra.mxu1 %v365_v5  ;;  %1966 = vmatprep.subr.mxu0 %v1620_v6  ;;  %v358_v19 = vld [vmem:[%s3161_s1 + $0x30] sm:$0xff]  ;;  %v357_v21 = vld [vmem:[%s3161_s1 + $0x28] sm:$0xff]  ;;  %v356_v24 = vld [vmem:[%s3161_s1 + $0x20] sm:$0xff] }
  0x13   : > { %2001 = vmatprep.subr.mxu1 %v364_v7  ;;  %1967 = vmatpush3.msra.mxu0 %v1620_v6  ;;  %v1611_v25 = vld [vmem:[%s3161_s1 + $0x98] sm:$0xff]  ;;  %v2540_v27 = vld [vmem:[%s328_s24] sm:$0xff]  ;;  %v2542_v28 = vld [vmem:[%s328_s24 + $0x8] sm:$0xff] }
  0x14   : > { %2002 = vmatpush3.msra.mxu1 %v364_v7  ;;  %1968 = vmatprep.subr.mxu0 %v1619_v8  ;;  %v355_v26 = vld [vmem:[%s3161_s1 + $0x18] sm:$0xff]  ;;  %v1610_v30 = vld [vmem:[%s3161_s1 + $0x90] sm:$0xff]  ;;  %v1609_v32 = vld [vmem:[%s3161_s1 + $0x88] sm:$0xff]  ;;  %v347_v34 = vrot.slane %v2540_v27, 7  ;;  %v348_v35 = vrot.slane %v2542_v28, 7  ;;  %v535_v38 = vrot.slane %v2540_v27, 1 }
  0x15   : > { %2003 = vmatprep.subr.mxu1 %v363_v9  ;;  %1969 = vmatpush3.msra.mxu0 %v1619_v8  ;;  %v354_v31 = vld [vmem:[%s3161_s1 + $0x10] sm:$0xff]  ;;  %v353_v33 = vld [vmem:[%s3161_s1 + $0x8] sm:$0xff]  ;;  %v1608_v36 = vld [vmem:[%s3161_s1 + $0x80] sm:$0xff]  ;;  %v536_v39 = vrot.slane %v2542_v28, 1 }
  0x16   : > { %2004 = vmatpush3.msra.mxu1 %v363_v9  ;;  %1970 = vmatprep.subr.mxu0 %v1618_v10  ;;  %v352_v37 = vld [vmem:[%s3161_s1] sm:$0xff]  ;;  %v351_v40 = vsel %vm349_vm0, %v348_v35, %v347_v34  ;;  %v350_v41 = vsel %vm349_vm0, %v347_v34, %v348_v35  ;;  %v1639_v42 = vld [vmem:[%s3161_s1 + $0x178] sm:$0xff]  ;;  %v1638_v44 = vld [vmem:[%s3161_s1 + $0x170] sm:$0xff]  ;;  %v2736_v35 = vadd.s32 8, %v2544_v29 }
  0x17   : > { %2005 = vmatprep.subr.mxu1 %v362_v11  ;;  %1971 = vmatpush3.msra.mxu0 %v1618_v10  ;;  %v538_v43 = vsel %vm537_vm1, %v535_v38, %v536_v39  ;;  %v1637_v45 = vld [vmem:[%s3161_s1 + $0x168] sm:$0xff]  ;;  %v1636_v46 = vld [vmem:[%s3161_s1 + $0x160] sm:$0xff]  ;;  %v1635_v47 = vld [vmem:[%s3161_s1 + $0x158] sm:$0xff]  ;;  %v539_v59 = vsel %vm537_vm1, %v536_v39, %v535_v38 }
  0x18   : > { %2006 = vmatpush3.msra.mxu1 %v362_v11  ;;  %1972 = vmatprep.subr.mxu0 %v1617_v12  ;;  %v1634_v48 = vld [vmem:[%s3161_s1 + $0x150] sm:$0xff]  ;;  %v1633_v49 = vld [vmem:[%s3161_s1 + $0x148] sm:$0xff]  ;;  %v1632_v50 = vld [vmem:[%s3161_s1 + $0x140] sm:$0xff]  ;;  %vm342_vm2 = vcmp.lt.s32.totalorder %v2736_v35, 15 }
  0x19   : > { %2007 = vmatprep.subr.mxu1 %v361_v13  ;;  %1973 = vmatpush3.msra.mxu0 %v1617_v12  ;;  %v1631_v51 = vld [vmem:[%s3161_s1 + $0x138] sm:$0xff]  ;;  %v1630_v52 = vld [vmem:[%s3161_s1 + $0x130] sm:$0xff]  ;;  %v1629_v53 = vld [vmem:[%s3161_s1 + $0x128] sm:$0xff] }
  0x1a   : > { %2008 = vmatpush3.msra.mxu1 %v361_v13  ;;  %1974 = vmatprep.subr.mxu0 %v1616_v14  ;;  %v1628_v54 = vld [vmem:[%s3161_s1 + $0x120] sm:$0xff]  ;;  %v1627_v55 = vld [vmem:[%s3161_s1 + $0x118] sm:$0xff]  ;;  %v1626_v56 = vld [vmem:[%s3161_s1 + $0x110] sm:$0xff] }
  0x1b   : > { %2009 = vmatprep.subr.mxu1 %v360_v15  ;;  %1975 = vmatpush3.msra.mxu0 %v1616_v14  ;;  %v1625_v57 = vld [vmem:[%s3161_s1 + $0x108] sm:$0xff]  ;;  %v1624_v58 = vld [vmem:[%s3161_s1 + $0x100] sm:$0xff]  ;;  %v1656_v60 = vld [vmem:[%s3163_s3 + $0xf8] sm:$0xff] }
  0x1c   : > { %2010 = vmatpush3.msra.mxu1 %v360_v15  ;;  %1976 = vmatprep.subr.mxu0 %v1615_v16  ;;  %v1655_v61 = vld [vmem:[%s3163_s3 + $0xf0] sm:$0xff]  ;;  %v666_v62 = vld [vmem:[%s3163_s3 + $0x78] sm:$0xff]  ;;  %v1654_v0 = vld [vmem:[%s3163_s3 + $0xe8] sm:$0xff] }
  0x1d   : > { %2011 = vmatprep.subr.mxu1 %v359_v17  ;;  %1977 = vmatpush3.msra.mxu0 %v1615_v16  ;;  %v665_v63 = vld [vmem:[%s3163_s3 + $0x70] sm:$0xff]  ;;  %v664_v1 = vld [vmem:[%s3163_s3 + $0x68] sm:$0xff]  ;;  %v1653_v2 = vld [vmem:[%s3163_s3 + $0xe0] sm:$0xff] }
  0x1e   : > { %2012 = vmatpush3.msra.mxu1 %v359_v17  ;;  %1978 = vmatprep.subr.mxu0 %v1614_v18  ;;  %v663_v3 = vld [vmem:[%s3163_s3 + $0x60] sm:$0xff]  ;;  %v1652_v4 = vld [vmem:[%s3163_s3 + $0xd8] sm:$0xff]  ;;  %v1651_v6 = vld [vmem:[%s3163_s3 + $0xd0] sm:$0xff] }
  0x1f   : > { %2013 = vmatprep.subr.mxu1 %v358_v19  ;;  %1979 = vmatpush3.msra.mxu0 %v1614_v18  ;;  %v662_v5 = vld [vmem:[%s3163_s3 + $0x58] sm:$0xff]  ;;  %v661_v7 = vld [vmem:[%s3163_s3 + $0x50] sm:$0xff]  ;;  %v1650_v8 = vld [vmem:[%s3163_s3 + $0xc8] sm:$0xff] }
  0x20   : > { %2014 = vmatpush3.msra.mxu1 %v358_v19  ;;  %1980 = vmatprep.subr.mxu0 %v1613_v20  ;;  %v660_v9 = vld [vmem:[%s3163_s3 + $0x48] sm:$0xff]  ;;  %v1649_v10 = vld [vmem:[%s3163_s3 + $0xc0] sm:$0xff]  ;;  %v1648_v12 = vld [vmem:[%s3163_s3 + $0xb8] sm:$0xff] }
  0x21   : > { %2015 = vmatprep.subr.mxu1 %v357_v21  ;;  %1981 = vmatpush3.msra.mxu0 %v1613_v20  ;;  %v659_v11 = vld [vmem:[%s3163_s3 + $0x40] sm:$0xff]  ;;  %v658_v13 = vld [vmem:[%s3163_s3 + $0x38] sm:$0xff]  ;;  %v1647_v14 = vld [vmem:[%s3163_s3 + $0xb0] sm:$0xff] }
  0x22   : > { %2016 = vmatpush3.msra.mxu1 %v357_v21  ;;  %1982 = vmatprep.subr.mxu0 %v1612_v23  ;;  %v1646_v15 = vld [vmem:[%s3163_s3 + $0xa8] sm:$0xff]  ;;  %v1645_v16 = vld [vmem:[%s3163_s3 + $0xa0] sm:$0xff]  ;;  %v657_v17 = vld [vmem:[%s3163_s3 + $0x30] sm:$0xff] }
  0x23   : > { %2017 = vmatprep.subr.mxu1 %v356_v24  ;;  %1983 = vmatpush3.msra.mxu0 %v1612_v23  ;;  %v1644_v18 = vld [vmem:[%s3163_s3 + $0x98] sm:$0xff]  ;;  %v656_v19 = vld [vmem:[%s3163_s3 + $0x28] sm:$0xff]  ;;  %v1643_v20 = vld [vmem:[%s3163_s3 + $0x90] sm:$0xff] }
  0x24   : > { %2018 = vmatpush3.msra.mxu1 %v356_v24  ;;  %1984 = vmatprep.subr.mxu0 %v1611_v25  ;;  %v655_v21 = vld [vmem:[%s3163_s3 + $0x20] sm:$0xff]  ;;  %v1642_v22 = vld [vmem:[%s3163_s3 + $0x88] sm:$0xff]  ;;  %v654_v23 = vld [vmem:[%s3163_s3 + $0x18] sm:$0xff] }
  0x25   : > { %2019 = vmatprep.subr.mxu1 %v355_v26  ;;  %1985 = vmatpush3.msra.mxu0 %v1611_v25  ;;  %v1641_v24 = vld [vmem:[%s3163_s3 + $0x80] sm:$0xff]  ;;  %v653_v25 = vld [vmem:[%s3163_s3 + $0x10] sm:$0xff] }
  0x26   : > { %2020 = vmatpush3.msra.mxu1 %v355_v26  ;;  %1986 = vmatprep.subr.mxu0 %v1610_v30  ;;  %v1674_v26 = vld [vmem:[%s3163_s3 + $0x178] sm:$0xff] }
  0x27   : > { %2021 = vmatprep.subr.mxu1 %v354_v31  ;;  %1987 = vmatpush3.msra.mxu0 %v1610_v30 }
  0x28   : > { %2022 = vmatpush3.msra.mxu1 %v354_v31  ;;  %1988 = vmatprep.subr.mxu0 %v1609_v32 }
  0x29   : > { %2023 = vmatprep.subr.mxu1 %v353_v33  ;;  %1989 = vmatpush3.msra.mxu0 %v1609_v32 }
  0x2a   : > { %2024 = vmatpush3.msra.mxu1 %v353_v33  ;;  %1990 = vmatprep.subr.mxu0 %v1608_v36 }
  0x2b   : > { %2025 = vmatprep.subr.mxu1 %v352_v37  ;;  %1991 = vmatpush3.msra.mxu0 %v1608_v36 }
  0x2c   : > { %1992 = vmatprep.mubr.f32.mxu0 %v2540_v27  ;;  %2026 = vmatpush3.msra.mxu1 %v352_v37  ;;  %v652_v27 = vld [vmem:[%s3163_s3 + $0x8] sm:$0xff]  ;;  %v1640_v37 = vld [vmem:[%s3162_s2] ss:$0 sm:$0xff] }
  0x2d   : > { %2027 = vmatprep.mubr.f32.mxu1 %v351_v40  ;;  %1993 = vmatmul.mubr.f32.vlgmr.msra.gmra.mxu0 %v2542_v28  ;;  %v651_v28 = vld [vmem:[%s3163_s3] sm:$0xff] }
  0x2e   : > { %2028 = vmatmul.mubr.f32.vlgmr.msra.gmra.mxu1 %v350_v41  ;;  %2030 = vmatprep.subr.mxu0 %v1639_v42 }
  0x2f   : > { %2062 = vmatprep.mubr.f32.mxu0 %v538_v43  ;;  %2031 = vmatpush3.msra.mxu0 %v1639_v42 }
  0x30   : > { %2032 = vmatprep.subr.mxu0 %v1638_v44  ;;  %2065 = vmatprep.subr.mxu1 %v1656_v60 }
  0x31   : > { %2033 = vmatpush3.msra.mxu0 %v1638_v44  ;;  %2066 = vmatpush3.msra.mxu1 %v1656_v60  ;;  %v1668_v60 = vld [vmem:[%s3163_s3 + $0x148] sm:$0xff] }
  0x32   : > { %2034 = vmatprep.subr.mxu0 %v1637_v45  ;;  %2067 = vmatprep.subr.mxu1 %v1655_v61 }
  0x33   : > { %2035 = vmatpush3.msra.mxu0 %v1637_v45  ;;  %2068 = vmatpush3.msra.mxu1 %v1655_v61  ;;  %v1667_v61 = vld [vmem:[%s3163_s3 + $0x140] sm:$0xff] }
  0x34   : > { %2036 = vmatprep.subr.mxu0 %v1636_v46  ;;  %2069 = vmatprep.subr.mxu1 %v1654_v0 }
  0x35   : > { %2037 = vmatpush3.msra.mxu0 %v1636_v46  ;;  %2070 = vmatpush3.msra.mxu1 %v1654_v0  ;;  %v1664_v0 = vld [vmem:[%s3163_s3 + $0x128] sm:$0xff] }
  0x36   : > { %2038 = vmatprep.subr.mxu0 %v1635_v47  ;;  %2071 = vmatprep.subr.mxu1 %v1653_v2 }
  0x37   : > { %2039 = vmatpush3.msra.mxu0 %v1635_v47  ;;  %2072 = vmatpush3.msra.mxu1 %v1653_v2  ;;  %v1662_v2 = vld [vmem:[%s3163_s3 + $0x118] sm:$0xff] }
  0x38   : > { %2040 = vmatprep.subr.mxu0 %v1634_v48  ;;  %2073 = vmatprep.subr.mxu1 %v1652_v4 }
  0x39   : > { %2041 = vmatpush3.msra.mxu0 %v1634_v48  ;;  %2074 = vmatpush3.msra.mxu1 %v1652_v4  ;;  %v1673_v48 = vld [vmem:[%s3163_s3 + $0x170] sm:$0xff]  ;;  %v1660_v4 = vld [vmem:[%s3163_s3 + $0x108] sm:$0xff] }
  0x3a   : > { %2042 = vmatprep.subr.mxu0 %v1633_v49  ;;  %2075 = vmatprep.subr.mxu1 %v1651_v6 }
  0x3b   : > { %2043 = vmatpush3.msra.mxu0 %v1633_v49  ;;  %2076 = vmatpush3.msra.mxu1 %v1651_v6 }
  0x3c   : > { %2044 = vmatprep.subr.mxu0 %v1632_v50  ;;  %2077 = vmatprep.subr.mxu1 %v1650_v8 }
  0x3d   : > { %2045 = vmatpush3.msra.mxu0 %v1632_v50  ;;  %2078 = vmatpush3.msra.mxu1 %v1650_v8  ;;  %v1690_v8 = vld [vmem:[%s3165_s5 + $0xf0] sm:$0xff] }
  0x3e   : > { %2046 = vmatprep.subr.mxu0 %v1631_v51  ;;  %2079 = vmatprep.subr.mxu1 %v1649_v10 }
  0x3f   : > { %2047 = vmatpush3.msra.mxu0 %v1631_v51  ;;  %2080 = vmatpush3.msra.mxu1 %v1649_v10  ;;  %v965_v10 = vld [vmem:[%s3165_s5 + $0x70] sm:$0xff] }
  0x40   : > { %2048 = vmatprep.subr.mxu0 %v1630_v52  ;;  %2081 = vmatprep.subr.mxu1 %v1648_v12 }
  0x41   : > { %2049 = vmatpush3.msra.mxu0 %v1630_v52  ;;  %2082 = vmatpush3.msra.mxu1 %v1648_v12  ;;  %v964_v12 = vld [vmem:[%s3165_s5 + $0x68] sm:$0xff] }
  0x42   : > { %2050 = vmatprep.subr.mxu0 %v1629_v53  ;;  %2083 = vmatprep.subr.mxu1 %v1647_v14 }
  0x43   : > { %2051 = vmatpush3.msra.mxu0 %v1629_v53  ;;  %2084 = vmatpush3.msra.mxu1 %v1647_v14  ;;  %v1672_v53 = vld [vmem:[%s3163_s3 + $0x168] sm:$0xff]  ;;  %v963_v14 = vld [vmem:[%s3165_s5 + $0x60] sm:$0xff] }
  0x44   : > { %2052 = vmatprep.subr.mxu0 %v1628_v54  ;;  %2085 = vmatprep.subr.mxu1 %v1646_v15 }
  0x45   : > { %2053 = vmatpush3.msra.mxu0 %v1628_v54  ;;  %2086 = vmatpush3.msra.mxu1 %v1646_v15  ;;  %v1687_v15 = vld [vmem:[%s3165_s5 + $0xd8] sm:$0xff] }
  0x46   : > { %2054 = vmatprep.subr.mxu0 %v1627_v55  ;;  %2087 = vmatprep.subr.mxu1 %v1645_v16 }
  0x47   : > { %2055 = vmatpush3.msra.mxu0 %v1627_v55  ;;  %2088 = vmatpush3.msra.mxu1 %v1645_v16  ;;  %v962_v16 = vld [vmem:[%s3165_s5 + $0x58] sm:$0xff] }
  0x48   : > { %2056 = vmatprep.subr.mxu0 %v1626_v56  ;;  %2089 = vmatprep.subr.mxu1 %v1644_v18 }
  0x49   : > { %2057 = vmatpush3.msra.mxu0 %v1626_v56  ;;  %2090 = vmatpush3.msra.mxu1 %v1644_v18  ;;  %v961_v18 = vld [vmem:[%s3165_s5 + $0x50] sm:$0xff] }
  0x4a   : > { %2058 = vmatprep.subr.mxu0 %v1625_v57  ;;  %2091 = vmatprep.subr.mxu1 %v1643_v20 }
  0x4b   : > { %2059 = vmatpush3.msra.mxu0 %v1625_v57  ;;  %2092 = vmatpush3.msra.mxu1 %v1643_v20  ;;  %v1671_v57 = vld [vmem:[%s3163_s3 + $0x160] sm:$0xff]  ;;  %v960_v20 = vld [vmem:[%s3165_s5 + $0x48] sm:$0xff] }
  0x4c   : > { %2060 = vmatprep.subr.mxu0 %v1624_v58  ;;  %2093 = vmatprep.subr.mxu1 %v1642_v22 }
  0x4d   : > { %2061 = vmatpush3.msra.mxu0 %v1624_v58  ;;  %2094 = vmatpush3.msra.mxu1 %v1642_v22  ;;  %v1670_v58 = vld [vmem:[%s3163_s3 + $0x158] sm:$0xff]  ;;  %v959_v22 = vld [vmem:[%s3165_s5 + $0x40] sm:$0xff] }
  0x4e   : > { %2063 = vmatmul.mubr.f32.vlgmr.msra.gmra.mxu0 %v539_v59  ;;  %2100 = vmatprep.subr.mxu0 %v666_v62  ;;  %v1669_v59 = vld [vmem:[%s3163_s3 + $0x150] sm:$0xff] }
  0x4f   : > { %2101 = vmatpush3.msra.mxu0 %v666_v62  ;;  %2095 = vmatprep.subr.mxu1 %v1641_v24  ;;  %v1666_v62 = vld [vmem:[%s3163_s3 + $0x138] sm:$0xff] }
  0x50   : > { %2102 = vmatprep.subr.mxu0 %v665_v63  ;;  %2096 = vmatpush3.msra.mxu1 %v1641_v24  ;;  %v1682_v24 = vld [vmem:[%s3165_s5 + $0xb0] sm:$0xff] }
  0x51   : > { %2103 = vmatpush3.msra.mxu0 %v665_v63  ;;  %2135 = vmatprep.subr.mxu1 %v1674_v26  ;;  %v1665_v63 = vld [vmem:[%s3163_s3 + $0x130] sm:$0xff] }
  0x52   : > { %2104 = vmatprep.subr.mxu0 %v664_v1 }
  0x53   : > { %2105 = vmatpush3.msra.mxu0 %v664_v1  ;;  %v1663_v1 = vld [vmem:[%s3163_s3 + $0x120] sm:$0xff] }
  0x54   : > { %2106 = vmatprep.subr.mxu0 %v663_v3 }
  0x55   : > { %2107 = vmatpush3.msra.mxu0 %v663_v3  ;;  %v1661_v3 = vld [vmem:[%s3163_s3 + $0x110] sm:$0xff] }
  0x56   : > { %2108 = vmatprep.subr.mxu0 %v662_v5 }
  0x57   : > { %2109 = vmatpush3.msra.mxu0 %v662_v5  ;;  %v1659_v5 = vld [vmem:[%s3163_s3 + $0x100] sm:$0xff] }
  0x58   : > { %2110 = vmatprep.subr.mxu0 %v661_v7 }
  0x59   : > { %2111 = vmatpush3.msra.mxu0 %v661_v7  ;;  %v1691_v7 = vld [vmem:[%s3165_s5 + $0xf8] sm:$0xff] }
  0x5a   : > { %2112 = vmatprep.subr.mxu0 %v660_v9 }
  0x5b   : > { %2113 = vmatpush3.msra.mxu0 %v660_v9  ;;  %v966_v9 = vld [vmem:[%s3165_s5 + $0x78] sm:$0xff] }
  0x5c   : > { %2114 = vmatprep.subr.mxu0 %v659_v11 }
  0x5d   : > { %2115 = vmatpush3.msra.mxu0 %v659_v11  ;;  %v1689_v11 = vld [vmem:[%s3165_s5 + $0xe8] sm:$0xff] }
  0x5e   : > { %2116 = vmatprep.subr.mxu0 %v658_v13 }
  0x5f   : > { %2117 = vmatpush3.msra.mxu0 %v658_v13  ;;  %v1688_v13 = vld [vmem:[%s3165_s5 + $0xe0] sm:$0xff] }
  0x60   : > { %2118 = vmatprep.subr.mxu0 %v657_v17 }
  0x61   : > { %2119 = vmatpush3.msra.mxu0 %v657_v17  ;;  %v1686_v17 = vld [vmem:[%s3165_s5 + $0xd0] sm:$0xff] }
  0x62   : > { %2120 = vmatprep.subr.mxu0 %v656_v19 }
  0x63   : > { %2121 = vmatpush3.msra.mxu0 %v656_v19  ;;  %v1685_v19 = vld [vmem:[%s3165_s5 + $0xc8] sm:$0xff] }
  0x64   : > { %2122 = vmatprep.subr.mxu0 %v655_v21 }
  0x65   : > { %2123 = vmatpush3.msra.mxu0 %v655_v21  ;;  %v1684_v21 = vld [vmem:[%s3165_s5 + $0xc0] sm:$0xff] }
  0x66   : > { %2124 = vmatprep.subr.mxu0 %v654_v23 }
  0x67   : > { %2125 = vmatpush3.msra.mxu0 %v654_v23  ;;  %v1683_v23 = vld [vmem:[%s3165_s5 + $0xb8] sm:$0xff] }
  0x68   : > { %2126 = vmatprep.subr.mxu0 %v653_v25 }
  0x69   : > { %2127 = vmatpush3.msra.mxu0 %v653_v25  ;;  %v1681_v25 = vld [vmem:[%s3165_s5 + $0xa8] sm:$0xff] }
  0x6a   : > { %2128 = vmatprep.subr.mxu0 %v652_v27 }
  0x6b   : > { %2129 = vmatpush3.msra.mxu0 %v652_v27  ;;  %v1680_v27 = vld [vmem:[%s3165_s5 + $0xa0] sm:$0xff] }
  0x6c   : > { %2130 = vmatprep.subr.mxu0 %v651_v28 }
  0x6d   : > { %2131 = vmatpush3.msra.mxu0 %v651_v28  ;;  %v957_v28 = vld [vmem:[%s3165_s5 + $0x30] sm:$0xff] }
  0x6e   : > { %2170 = vmatprep.subr.mxu0 %v1691_v7 }
  0xed   : > { %v1994_v30 = vpop.f32.mrf.mxu0 }
  0xee   : > { %v2029_v31 = vpop.f32.mrf.mxu1 }
  0xef   : > { %v451_v32 = vpop.f32.mrf.mxu0  ;;  %v532_v34 = vadd.f32 %v2029_v31, %v1994_v30  ;;  %v1679_v30 = vld [vmem:[%s3165_s5 + $0x98] sm:$0xff]  ;;  %v956_v31 = vld [vmem:[%s3165_s5 + $0x28] sm:$0xff] }
  0xf0   : > { %v526_v33 = vpop.f32.mrf.mxu1 }
  0xf1   : > { %v527_v38 = vadd.f32 %v526_v33, %v451_v32  ;;  %v1678_v32 = vld [vmem:[%s3165_s5 + $0x90] sm:$0xff]  ;;  %v955_v33 = vld [vmem:[%s3165_s5 + $0x20] sm:$0xff] }
 0x10e   : > { %v2064_v36 = vpop.f32.mrf.mxu0 }
 0x10f   : > { %v633_v39 = vadd.f32 %v2064_v36, %v532_v34  ;;  %v1677_v34 = vld [vmem:[%s3165_s5 + $0x88] sm:$0xff]  ;;  %v954_v36 = vld [vmem:[%s3165_s5 + $0x18] sm:$0xff] }
 0x110   : > { %v623_v40 = vpop.f32.mrf.mxu0 }
 0x111   : > { %v642_v41 = vadd.f32 %v1640_v37, %v633_v39  ;;  %v632_v42 = vadd.f32 %v623_v40, %v527_v38  ;;  %v953_v38 = vld [vmem:[%s3165_s5 + $0x10] sm:$0xff]  ;;  %v952_v39 = vld [vmem:[%s3165_s5 + $0x8] sm:$0xff]  ;;  %v1707_v40 = vld [vmem:[%s3165_s5 + $0x178] sm:$0xff] }
 0x113   : > { %v644_v43 = vmax.f32 %v642_v41, 0.0  ;;  %v641_v44 = vadd.f32 %v1640_v37, %v632_v42  ;;  %v1676_v37 = vld [vmem:[%s3165_s5 + $0x80] sm:$0xff] }
 0x114   : > { %v951_v41 = vld [vmem:[%s3165_s5] sm:$0xff] }
 0x115   : > { %v2745_v45 = vsel %vm342_vm2, %v644_v43, 0.0  ;;  %v643_v46 = vmax.f32 %v641_v44, 0.0 }
 0x116   : > { %v648_v50 = vrot.slane %v2745_v45, 7  ;;  %v835_v52 = vrot.slane %v2745_v45, 1 }
 0x117   : > { %v2749_v47 = vsel %vm339_vm3, %v643_v46, 0.0  ;;  %2097 = vmatprep.mubr.msk.f32.mxu1 %vm339_vm3, %v643_v46 }
 0x118   : > { %2098 = vmatmul.mubr.msk.f32.vlgmr.msra.gmra.mxu1 %vm342_vm2, %v644_v43  ;;  %v647_v49 = vrot.slane %v2749_v47, 7  ;;  %v834_v51 = vrot.slane %v2749_v47, 1 }
 0x119   : > { %2136 = vmatpush3.msra.mxu1 %v1674_v26  ;;  %v958_v26 = vld [vmem:[%s3165_s5 + $0x38] sm:$0xff] }
 0x11a   : > { %2137 = vmatprep.subr.mxu1 %v1673_v48  ;;  %v650_v54 = vsel %vm349_vm0, %v648_v50, %v647_v49  ;;  %v836_v55 = vsel %vm537_vm1, %v834_v51, %v835_v52  ;;  %v649_v56 = vsel %vm349_vm0, %v647_v49, %v648_v50  ;;  %v837_v6 = vsel %vm537_vm1, %v835_v52, %v834_v51  ;;  %v1675_v50 = vld [vmem:[%s3164_s4] ss:$0 sm:$0xff] }
 0x11b   : > { %2138 = vmatpush3.msra.mxu1 %v1673_v48  ;;  %2132 = vmatprep.mubr.f32.mxu0 %v650_v54 }
 0x11c   : > { %2139 = vmatprep.subr.mxu1 %v1672_v53  ;;  %2167 = vmatprep.mubr.f32.mxu1 %v836_v55 }
 0x11d   : > { %2133 = vmatmul.mubr.f32.vlgmr.msra.gmra.mxu0 %v649_v56  ;;  %2140 = vmatpush3.msra.mxu1 %v1672_v53 }
 0x11e   : > { %2141 = vmatprep.subr.mxu1 %v1671_v57  ;;  %2171 = vmatpush3.msra.mxu0 %v1691_v7  ;;  %v1703_v7 = vld [vmem:[%s3165_s5 + $0x158] sm:$0xff] }
 0x11f   : > { %2142 = vmatpush3.msra.mxu1 %v1671_v57  ;;  %2172 = vmatprep.subr.mxu0 %v1690_v8 }
 0x120   : > { %2143 = vmatprep.subr.mxu1 %v1670_v58  ;;  %2173 = vmatpush3.msra.mxu0 %v1690_v8  ;;  %v1702_v8 = vld [vmem:[%s3165_s5 + $0x150] sm:$0xff] }
 0x121   : > { %2144 = vmatpush3.msra.mxu1 %v1670_v58  ;;  %2174 = vmatprep.subr.mxu0 %v1689_v11 }
 0x122   : > { %2145 = vmatprep.subr.mxu1 %v1669_v59  ;;  %2175 = vmatpush3.msra.mxu0 %v1689_v11  ;;  %v1699_v11 = vld [vmem:[%s3165_s5 + $0x138] sm:$0xff] }
 0x123   : > { %2146 = vmatpush3.msra.mxu1 %v1669_v59  ;;  %2176 = vmatprep.subr.mxu0 %v1688_v13 }
 0x124   : > { %2147 = vmatprep.subr.mxu1 %v1668_v60  ;;  %2177 = vmatpush3.msra.mxu0 %v1688_v13  ;;  %v1697_v13 = vld [vmem:[%s3165_s5 + $0x128] sm:$0xff] }
 0x125   : > { %2148 = vmatpush3.msra.mxu1 %v1668_v60  ;;  %2178 = vmatprep.subr.mxu0 %v1687_v15 }
 0x126   : > { %2149 = vmatprep.subr.mxu1 %v1667_v61  ;;  %2179 = vmatpush3.msra.mxu0 %v1687_v15  ;;  %v1695_v15 = vld [vmem:[%s3165_s5 + $0x118] sm:$0xff] }
 0x127   : > { %2150 = vmatpush3.msra.mxu1 %v1667_v61  ;;  %2180 = vmatprep.subr.mxu0 %v1686_v17 }
 0x128   : > { %2151 = vmatprep.subr.mxu1 %v1666_v62  ;;  %2181 = vmatpush3.msra.mxu0 %v1686_v17  ;;  %v1693_v17 = vld [vmem:[%s3165_s5 + $0x108] sm:$0xff] }
 0x129   : > { %2152 = vmatpush3.msra.mxu1 %v1666_v62  ;;  %2182 = vmatprep.subr.mxu0 %v1685_v19 }
 0x12a   : > { %2153 = vmatprep.subr.mxu1 %v1665_v63  ;;  %2183 = vmatpush3.msra.mxu0 %v1685_v19 }
 0x12b   : > { %2154 = vmatpush3.msra.mxu1 %v1665_v63  ;;  %2184 = vmatprep.subr.mxu0 %v1684_v21  ;;  %v1706_v63 = vld [vmem:[%s3165_s5 + $0x170] sm:$0xff] }
 0x12c   : > { %2155 = vmatprep.subr.mxu1 %v1664_v0  ;;  %2185 = vmatpush3.msra.mxu0 %v1684_v21  ;;  %v1723_v21 = vld [vmem:[%s3167_s7 + $0xf0] sm:$0xff] }
 0x12d   : > { %2156 = vmatpush3.msra.mxu1 %v1664_v0  ;;  %2186 = vmatprep.subr.mxu0 %v1683_v23 }
 0x12e   : > { %2157 = vmatprep.subr.mxu1 %v1663_v1  ;;  %2187 = vmatpush3.msra.mxu0 %v1683_v23  ;;  %v1265_v23 = vld [vmem:[%s3167_s7 + $0x70] sm:$0xff] }
 0x12f   : > { %2158 = vmatpush3.msra.mxu1 %v1663_v1  ;;  %2188 = vmatprep.subr.mxu0 %v1682_v24 }
 0x130   : > { %2159 = vmatprep.subr.mxu1 %v1662_v2  ;;  %2189 = vmatpush3.msra.mxu0 %v1682_v24  ;;  %v1722_v24 = vld [vmem:[%s3167_s7 + $0xe8] sm:$0xff] }
 0x131   : > { %2160 = vmatpush3.msra.mxu1 %v1662_v2  ;;  %2190 = vmatprep.subr.mxu0 %v1681_v25 }
 0x132   : > { %2161 = vmatprep.subr.mxu1 %v1661_v3  ;;  %2191 = vmatpush3.msra.mxu0 %v1681_v25  ;;  %v1264_v25 = vld [vmem:[%s3167_s7 + $0x68] sm:$0xff] }
 0x133   : > { %2162 = vmatpush3.msra.mxu1 %v1661_v3  ;;  %2192 = vmatprep.subr.mxu0 %v1680_v27 }
 0x134   : > { %2163 = vmatprep.subr.mxu1 %v1660_v4  ;;  %2193 = vmatpush3.msra.mxu0 %v1680_v27  ;;  %v1263_v27 = vld [vmem:[%s3167_s7 + $0x60] sm:$0xff] }
 0x135   : > { %2164 = vmatpush3.msra.mxu1 %v1660_v4  ;;  %2194 = vmatprep.subr.mxu0 %v1679_v30 }
 0x136   : > { %2165 = vmatprep.subr.mxu1 %v1659_v5  ;;  %2195 = vmatpush3.msra.mxu0 %v1679_v30  ;;  %v1262_v30 = vld [vmem:[%s3167_s7 + $0x58] sm:$0xff] }
 0x137   : > { %2166 = vmatpush3.msra.mxu1 %v1659_v5  ;;  %2196 = vmatprep.subr.mxu0 %v1678_v32  ;;  %v1705_v5 = vld [vmem:[%s3165_s5 + $0x168] sm:$0xff] }
 0x138   : > { %2168 = vmatmul.mubr.f32.vlgmr.msra.gmra.mxu1 %v837_v6  ;;  %2205 = vmatprep.subr.mxu1 %v966_v9  ;;  %v1704_v6 = vld [vmem:[%s3165_s5 + $0x160] sm:$0xff] }
 0x139   : > { %2206 = vmatpush3.msra.mxu1 %v966_v9  ;;  %2197 = vmatpush3.msra.mxu0 %v1678_v32  ;;  %v1701_v9 = vld [vmem:[%s3165_s5 + $0x148] sm:$0xff]  ;;  %v1261_v32 = vld [vmem:[%s3167_s7 + $0x50] sm:$0xff] }
 0x13a   : > { %2207 = vmatprep.subr.mxu1 %v965_v10  ;;  %2198 = vmatprep.subr.mxu0 %v1677_v34 }
 0x13b   : > { %2208 = vmatpush3.msra.mxu1 %v965_v10  ;;  %2199 = vmatpush3.msra.mxu0 %v1677_v34  ;;  %v1700_v10 = vld [vmem:[%s3165_s5 + $0x140] sm:$0xff]  ;;  %v1260_v34 = vld [vmem:[%s3167_s7 + $0x48] sm:$0xff] }
 0x13c   : > { %2209 = vmatprep.subr.mxu1 %v964_v12  ;;  %2200 = vmatprep.subr.mxu0 %v1676_v37 }
 0x13d   : > { %2210 = vmatpush3.msra.mxu1 %v964_v12  ;;  %2201 = vmatpush3.msra.mxu0 %v1676_v37  ;;  %v1698_v12 = vld [vmem:[%s3165_s5 + $0x130] sm:$0xff]  ;;  %v1259_v37 = vld [vmem:[%s3167_s7 + $0x40] sm:$0xff] }
 0x13e   : > { %2211 = vmatprep.subr.mxu1 %v963_v14  ;;  %2240 = vmatprep.subr.mxu0 %v1707_v40 }
 0x13f   : > { %2212 = vmatpush3.msra.mxu1 %v963_v14  ;;  %v1696_v14 = vld [vmem:[%s3165_s5 + $0x120] sm:$0xff] }
 0x140   : > { %2213 = vmatprep.subr.mxu1 %v962_v16 }
 0x141   : > { %2214 = vmatpush3.msra.mxu1 %v962_v16  ;;  %v1694_v16 = vld [vmem:[%s3165_s5 + $0x110] sm:$0xff] }
 0x142   : > { %2215 = vmatprep.subr.mxu1 %v961_v18 }
 0x143   : > { %2216 = vmatpush3.msra.mxu1 %v961_v18  ;;  %v1692_v18 = vld [vmem:[%s3165_s5 + $0x100] sm:$0xff] }
 0x144   : > { %2217 = vmatprep.subr.mxu1 %v960_v20 }
 0x145   : > { %2218 = vmatpush3.msra.mxu1 %v960_v20  ;;  %v1724_v20 = vld [vmem:[%s3167_s7 + $0xf8] sm:$0xff] }
 0x146   : > { %2219 = vmatprep.subr.mxu1 %v959_v22 }
 0x147   : > { %2220 = vmatpush3.msra.mxu1 %v959_v22  ;;  %v1266_v22 = vld [vmem:[%s3167_s7 + $0x78] sm:$0xff] }
 0x148   : > { %2221 = vmatprep.subr.mxu1 %v958_v26 }
 0x149   : > { %2222 = vmatpush3.msra.mxu1 %v958_v26  ;;  %v1721_v26 = vld [vmem:[%s3167_s7 + $0xe0] sm:$0xff] }
 0x14a   : > { %2223 = vmatprep.subr.mxu1 %v957_v28 }
 0x14b   : > { %2224 = vmatpush3.msra.mxu1 %v957_v28  ;;  %v1720_v28 = vld [vmem:[%s3167_s7 + $0xd8] sm:$0xff] }
 0x14c   : > { %2225 = vmatprep.subr.mxu1 %v956_v31 }
 0x14d   : > { %2226 = vmatpush3.msra.mxu1 %v956_v31  ;;  %v1719_v31 = vld [vmem:[%s3167_s7 + $0xd0] sm:$0xff] }
 0x14e   : > { %2227 = vmatprep.subr.mxu1 %v955_v33 }
 0x14f   : > { %2228 = vmatpush3.msra.mxu1 %v955_v33  ;;  %v1718_v33 = vld [vmem:[%s3167_s7 + $0xc8] sm:$0xff] }
 0x150   : > { %2229 = vmatprep.subr.mxu1 %v954_v36 }
 0x151   : > { %2230 = vmatpush3.msra.mxu1 %v954_v36  ;;  %v1717_v36 = vld [vmem:[%s3167_s7 + $0xc0] sm:$0xff] }
 0x152   : > { %2231 = vmatprep.subr.mxu1 %v953_v38 }
 0x153   : > { %2232 = vmatpush3.msra.mxu1 %v953_v38  ;;  %v1716_v38 = vld [vmem:[%s3167_s7 + $0xb8] sm:$0xff] }
 0x154   : > { %2233 = vmatprep.subr.mxu1 %v952_v39 }
 0x155   : > { %2234 = vmatpush3.msra.mxu1 %v952_v39  ;;  %v1715_v39 = vld [vmem:[%s3167_s7 + $0xb0] sm:$0xff] }
 0x156   : > { %2235 = vmatprep.subr.mxu1 %v951_v41 }
 0x157   : > { %2236 = vmatpush3.msra.mxu1 %v951_v41  ;;  %v1258_v41 = vld [vmem:[%s3167_s7 + $0x38] sm:$0xff] }
 0x158   : > { %2275 = vmatprep.subr.mxu1 %v1724_v20 }
 0x1d8   : > { %v2099_v42 = vpop.f32.mrf.mxu1 }
 0x1da   : > { %v750_v44 = vpop.f32.mrf.mxu1 }
 0x1dd   : > { %v2134_v43 = vpop.f32.mrf.mxu0 }
 0x1de   : > { %v831_v48 = vadd.f32 %v2134_v43, %v2099_v42  ;;  %v1713_v42 = vld [vmem:[%s3167_s7 + $0xa0] sm:$0xff]  ;;  %v1257_v43 = vld [vmem:[%s3167_s7 + $0x30] sm:$0xff] }
 0x1df   : > { %v825_v46 = vpop.f32.mrf.mxu0 }
 0x1e0   : > { %v826_v51 = vadd.f32 %v825_v46, %v750_v44  ;;  %v1712_v44 = vld [vmem:[%s3167_s7 + $0x98] sm:$0xff]  ;;  %v1256_v46 = vld [vmem:[%s3167_s7 + $0x28] sm:$0xff] }
 0x1f8   : > { %v2169_v49 = vpop.f32.mrf.mxu1 }
 0x1f9   : > { %v931_v52 = vadd.f32 %v2169_v49, %v831_v48  ;;  %v1711_v48 = vld [vmem:[%s3167_s7 + $0x90] sm:$0xff]  ;;  %v1255_v49 = vld [vmem:[%s3167_s7 + $0x20] sm:$0xff] }
 0x1fa   : > { %v921_v53 = vpop.f32.mrf.mxu1 }
 0x1fb   : > { %v940_v54 = vadd.f32 %v1675_v50, %v931_v52  ;;  %v930_v55 = vadd.f32 %v921_v53, %v826_v51  ;;  %v1254_v51 = vld [vmem:[%s3167_s7 + $0x18] sm:$0xff]  ;;  %v1709_v52 = vld [vmem:[%s3167_s7 + $0x80] sm:$0xff]  ;;  %v1253_v53 = vld [vmem:[%s3167_s7 + $0x10] sm:$0xff] }
 0x1fd   : > { %v942_v56 = vmax.f32 %v940_v54, 0.0  ;;  %v939_v57 = vadd.f32 %v1675_v50, %v930_v55  ;;  %v1710_v50 = vld [vmem:[%s3167_s7 + $0x88] sm:$0xff]  ;;  %v1740_v55 = vld [vmem:[%s3167_s7 + $0x178] sm:$0xff] }
 0x1fe   : > { %v1252_v54 = vld [vmem:[%s3167_s7 + $0x8] sm:$0xff] }
 0x1ff   : > { %v944_v58 = vsel %vm342_vm2, %v942_v56, 0.0  ;;  %v941_v59 = vmax.f32 %v939_v57, 0.0  ;;  %v1251_v56 = vld [vmem:[%s3167_s7] sm:$0xff] }
 0x200   : > { %v2917_v60 = vadd.f32 %v944_v58, %v2745_v45 }
 0x201   : > { %v943_v61 = vsel %vm339_vm3, %v941_v59, 0.0 }
 0x202   : > { %v2922_v62 = vadd.f32 %v943_v61, %v2749_v47  ;;  %v948_v1 = vrot.slane %v2917_v60, 7  ;;  %v1135_v45 = vrot.slane %v2917_v60, 1 }
 0x204   : > { %2202 = vmatprep.mubr.f32.mxu0 %v2922_v62  ;;  %v947_v0 = vrot.slane %v2922_v62, 7  ;;  %v1134_v2 = vrot.slane %v2922_v62, 1 }
 0x205   : > { %2203 = vmatmul.mubr.f32.vlgmr.msra.gmra.mxu0 %v2917_v60 }
 0x206   : > { %2241 = vmatpush3.msra.mxu0 %v1707_v40  ;;  %v950_v47 = vsel %vm349_vm0, %v948_v1, %v947_v0  ;;  %v1136_v3 = vsel %vm537_vm1, %v1134_v2, %v1135_v45  ;;  %v949_v4 = vsel %vm349_vm0, %v947_v0, %v948_v1  ;;  %v1137_v19 = vsel %vm537_vm1, %v1135_v45, %v1134_v2  ;;  %v1714_v40 = vld [vmem:[%s3167_s7 + $0xa8] sm:$0xff]  ;;  %v1708_v1 = vld [vmem:[%s3166_s6] ss:$0 sm:$0xff] }
 0x207   : > { %2242 = vmatprep.subr.mxu0 %v1706_v63  ;;  %2237 = vmatprep.mubr.f32.mxu1 %v950_v47 }
 0x208   : > { %2243 = vmatpush3.msra.mxu0 %v1706_v63  ;;  %2272 = vmatprep.mubr.f32.mxu0 %v1136_v3 }
 0x209   : > { %2238 = vmatmul.mubr.f32.vlgmr.msra.gmra.mxu1 %v949_v4  ;;  %2244 = vmatprep.subr.mxu0 %v1705_v5 }
 0x20a   : > { %2245 = vmatpush3.msra.mxu0 %v1705_v5  ;;  %2276 = vmatpush3.msra.mxu1 %v1724_v20  ;;  %v1735_v20 = vld [vmem:[%s3167_s7 + $0x150] sm:$0xff] }
 0x20b   : > { %2246 = vmatprep.subr.mxu0 %v1704_v6  ;;  %2277 = vmatprep.subr.mxu1 %v1723_v21 }
 0x20c   : > { %2247 = vmatpush3.msra.mxu0 %v1704_v6  ;;  %2278 = vmatpush3.msra.mxu1 %v1723_v21  ;;  %v1734_v21 = vld [vmem:[%s3167_s7 + $0x148] sm:$0xff] }
 0x20d   : > { %2248 = vmatprep.subr.mxu0 %v1703_v7  ;;  %2279 = vmatprep.subr.mxu1 %v1722_v24 }
 0x20e   : > { %2249 = vmatpush3.msra.mxu0 %v1703_v7  ;;  %2280 = vmatpush3.msra.mxu1 %v1722_v24  ;;  %v1731_v24 = vld [vmem:[%s3167_s7 + $0x130] sm:$0xff] }
 0x20f   : > { %2250 = vmatprep.subr.mxu0 %v1702_v8  ;;  %2281 = vmatprep.subr.mxu1 %v1721_v26 }
 0x210   : > { %2251 = vmatpush3.msra.mxu0 %v1702_v8  ;;  %2282 = vmatpush3.msra.mxu1 %v1721_v26  ;;  %v1729_v26 = vld [vmem:[%s3167_s7 + $0x120] sm:$0xff] }
 0x211   : > { %2252 = vmatprep.subr.mxu0 %v1701_v9  ;;  %2283 = vmatprep.subr.mxu1 %v1720_v28 }
 0x212   : > { %2253 = vmatpush3.msra.mxu0 %v1701_v9  ;;  %2284 = vmatpush3.msra.mxu1 %v1720_v28  ;;  %v1727_v28 = vld [vmem:[%s3167_s7 + $0x110] sm:$0xff] }
 0x213   : > { %2254 = vmatprep.subr.mxu0 %v1700_v10  ;;  %2285 = vmatprep.subr.mxu1 %v1719_v31 }
 0x214   : > { %2255 = vmatpush3.msra.mxu0 %v1700_v10  ;;  %2286 = vmatpush3.msra.mxu1 %v1719_v31  ;;  %v1725_v31 = vld [vmem:[%s3167_s7 + $0x100] sm:$0xff] }
 0x215   : > { %2256 = vmatprep.subr.mxu0 %v1699_v11  ;;  %2287 = vmatprep.subr.mxu1 %v1718_v33 }
 0x216   : > { %2257 = vmatpush3.msra.mxu0 %v1699_v11  ;;  %2288 = vmatpush3.msra.mxu1 %v1718_v33 }
 0x217   : > { %2258 = vmatprep.subr.mxu0 %v1698_v12  ;;  %2289 = vmatprep.subr.mxu1 %v1717_v36 }
 0x218   : > { %2259 = vmatpush3.msra.mxu0 %v1698_v12  ;;  %2290 = vmatpush3.msra.mxu1 %v1717_v36  ;;  %v1739_v12 = vld [vmem:[%s3167_s7 + $0x170] sm:$0xff] }
 0x219   : > { %2260 = vmatprep.subr.mxu0 %v1697_v13  ;;  %2291 = vmatprep.subr.mxu1 %v1716_v38 }
 0x21a   : > { %2261 = vmatpush3.msra.mxu0 %v1697_v13  ;;  %2292 = vmatpush3.msra.mxu1 %v1716_v38 }
 0x21b   : > { %2262 = vmatprep.subr.mxu0 %v1696_v14  ;;  %2293 = vmatprep.subr.mxu1 %v1715_v39 }
 0x21c   : > { %2263 = vmatpush3.msra.mxu0 %v1696_v14  ;;  %2294 = vmatpush3.msra.mxu1 %v1715_v39 }
 0x21d   : > { %2264 = vmatprep.subr.mxu0 %v1695_v15  ;;  %2295 = vmatprep.subr.mxu1 %v1714_v40 }
 0x21e   : > { %2265 = vmatpush3.msra.mxu0 %v1695_v15  ;;  %2296 = vmatpush3.msra.mxu1 %v1714_v40 }
 0x21f   : > { %2266 = vmatprep.subr.mxu0 %v1694_v16  ;;  %2297 = vmatprep.subr.mxu1 %v1713_v42 }
 0x220   : > { %2267 = vmatpush3.msra.mxu0 %v1694_v16  ;;  %2298 = vmatpush3.msra.mxu1 %v1713_v42 }
 0x221   : > { %2268 = vmatprep.subr.mxu0 %v1693_v17  ;;  %2299 = vmatprep.subr.mxu1 %v1712_v44 }
 0x222   : > { %2269 = vmatpush3.msra.mxu0 %v1693_v17  ;;  %2300 = vmatpush3.msra.mxu1 %v1712_v44  ;;  %v1738_v17 = vld [vmem:[%s3167_s7 + $0x168] sm:$0xff] }
 0x223   : > { %2270 = vmatprep.subr.mxu0 %v1692_v18  ;;  %2301 = vmatprep.subr.mxu1 %v1711_v48 }
 0x224   : > { %2271 = vmatpush3.msra.mxu0 %v1692_v18  ;;  %2302 = vmatpush3.msra.mxu1 %v1711_v48  ;;  %v1737_v18 = vld [vmem:[%s3167_s7 + $0x160] sm:$0xff] }
 0x225   : > { %2273 = vmatmul.mubr.f32.vlgmr.msra.gmra.mxu0 %v1137_v19  ;;  %2310 = vmatprep.subr.mxu0 %v1266_v22  ;;  %v1736_v19 = vld [vmem:[%s3167_s7 + $0x158] sm:$0xff] }
 0x226   : > { %2311 = vmatpush3.msra.mxu0 %v1266_v22  ;;  %2303 = vmatprep.subr.mxu1 %v1710_v50  ;;  %v1733_v22 = vld [vmem:[%s3167_s7 + $0x140] sm:$0xff] }
 0x227   : > { %2312 = vmatprep.subr.mxu0 %v1265_v23  ;;  %2304 = vmatpush3.msra.mxu1 %v1710_v50 }
 0x228   : > { %2313 = vmatpush3.msra.mxu0 %v1265_v23  ;;  %2305 = vmatprep.subr.mxu1 %v1709_v52  ;;  %v1732_v23 = vld [vmem:[%s3167_s7 + $0x138] sm:$0xff] }
 0x229   : > { %2314 = vmatprep.subr.mxu0 %v1264_v25  ;;  %2306 = vmatpush3.msra.mxu1 %v1709_v52 }
 0x22a   : > { %2315 = vmatpush3.msra.mxu0 %v1264_v25  ;;  %2345 = vmatprep.subr.mxu1 %v1740_v55  ;;  %v1730_v25 = vld [vmem:[%s3167_s7 + $0x128] sm:$0xff] }
 0x22b   : > { %2316 = vmatprep.subr.mxu0 %v1263_v27 }
 0x22c   : > { %2317 = vmatpush3.msra.mxu0 %v1263_v27  ;;  %v1728_v27 = vld [vmem:[%s3167_s7 + $0x118] sm:$0xff] }
 0x22d   : > { %2318 = vmatprep.subr.mxu0 %v1262_v30 }
 0x22e   : > { %2319 = vmatpush3.msra.mxu0 %v1262_v30  ;;  %v1726_v30 = vld [vmem:[%s3167_s7 + $0x108] sm:$0xff] }
 0x22f   : > { %2320 = vmatprep.subr.mxu0 %v1261_v32 }
 0x230   : > { %2321 = vmatpush3.msra.mxu0 %v1261_v32 }
 0x231   : > { %2322 = vmatprep.subr.mxu0 %v1260_v34 }
 0x232   : > { %2323 = vmatpush3.msra.mxu0 %v1260_v34 }
 0x233   : > { %2324 = vmatprep.subr.mxu0 %v1259_v37 }
 0x234   : > { %2325 = vmatpush3.msra.mxu0 %v1259_v37 }
 0x235   : > { %2326 = vmatprep.subr.mxu0 %v1258_v41 }
 0x236   : > { %2327 = vmatpush3.msra.mxu0 %v1258_v41 }
 0x237   : > { %2328 = vmatprep.subr.mxu0 %v1257_v43 }
 0x238   : > { %2329 = vmatpush3.msra.mxu0 %v1257_v43  ;;  %v1741_v43 = vld [vmem:[%s3168_s8] ss:$0 sm:$0xff] }
 0x239   : > { %2330 = vmatprep.subr.mxu0 %v1256_v46 }
 0x23a   : > { %2331 = vmatpush3.msra.mxu0 %v1256_v46 }
 0x23b   : > { %2332 = vmatprep.subr.mxu0 %v1255_v49 }
 0x23c   : > { %2333 = vmatpush3.msra.mxu0 %v1255_v49 }
 0x23d   : > { %2334 = vmatprep.subr.mxu0 %v1254_v51 }
 0x23e   : > { %2335 = vmatpush3.msra.mxu0 %v1254_v51 }
 0x23f   : > { %2336 = vmatprep.subr.mxu0 %v1253_v53 }
 0x240   : > { %2337 = vmatpush3.msra.mxu0 %v1253_v53 }
 0x241   : > { %2338 = vmatprep.subr.mxu0 %v1252_v54 }
 0x242   : > { %2339 = vmatpush3.msra.mxu0 %v1252_v54 }
 0x243   : > { %2340 = vmatprep.subr.mxu0 %v1251_v56 }
 0x244   : > { %2341 = vmatpush3.msra.mxu0 %v1251_v56 }
 0x2c5   : > { %v2204_v57 = vpop.f32.mrf.mxu0 }
 0x2c7   : > { %v1050_v59 = vpop.f32.mrf.mxu0 }
 0x2c9   : > { %v2239_v58 = vpop.f32.mrf.mxu1 }
 0x2ca   : > { %v1131_v63 = vadd.f32 %v2239_v58, %v2204_v57 }
 0x2cb   : > { %v1125_v61 = vpop.f32.mrf.mxu1 }
 0x2cc   : > { %v1126_v2 = vadd.f32 %v1125_v61, %v1050_v59 }
 0x2e5   : > { %v2274_v0 = vpop.f32.mrf.mxu0 }
 0x2e6   : > { %v1231_v45 = vadd.f32 %v2274_v0, %v1131_v63 }
 0x2e7   : > { %v1221_v47 = vpop.f32.mrf.mxu0 }
 0x2e8   : > { %v1240_v3 = vadd.f32 %v1708_v1, %v1231_v45  ;;  %v1230_v4 = vadd.f32 %v1221_v47, %v1126_v2 }
 0x2ea   : > { %v1242_v5 = vmax.f32 %v1240_v3, 0.0  ;;  %v1239_v6 = vadd.f32 %v1708_v1, %v1230_v4 }
 0x2ec   : > { %v1244_v7 = vsel %vm342_vm2, %v1242_v5, 0.0  ;;  %v1241_v8 = vmax.f32 %v1239_v6, 0.0 }
 0x2ed   : > { %v3088_v9 = vadd.f32 %v1244_v7, %v2917_v60 }
 0x2ee   : > { %v1243_v10 = vsel %vm339_vm3, %v1241_v8, 0.0 }
 0x2ef   : > { %v1245_v11 = vadd.f32 %v1243_v10, %v2922_v62  ;;  %v1248_v14 = vrot.slane %v3088_v9, 7  ;;  %v1435_v35 = vrot.slane %v3088_v9, 1 }
 0x2f1   : > { %2307 = vmatprep.mubr.f32.mxu1 %v1245_v11  ;;  %v1247_v13 = vrot.slane %v1245_v11, 7  ;;  %v1434_v15 = vrot.slane %v1245_v11, 1 }
 0x2f2   : > { %2308 = vmatmul.mubr.f32.vlgmr.msra.gmra.mxu1 %v3088_v9 }
 0x2f3   : > { %2346 = vmatpush3.msra.mxu1 %v1740_v55  ;;  %v1250_v60 = vsel %vm349_vm0, %v1248_v14, %v1247_v13  ;;  %v1436_v62 = vsel %vm537_vm1, %v1434_v15, %v1435_v35  ;;  %v1249_v16 = vsel %vm349_vm0, %v1247_v13, %v1248_v14  ;;  %v1437_v32 = vsel %vm537_vm1, %v1435_v35, %v1434_v15 }
 0x2f4   : > { %2347 = vmatprep.subr.mxu1 %v1739_v12  ;;  %2342 = vmatprep.mubr.f32.mxu0 %v1250_v60 }
 0x2f5   : > { %2348 = vmatpush3.msra.mxu1 %v1739_v12  ;;  %2377 = vmatprep.mubr.f32.mxu1 %v1436_v62 }
 0x2f6   : > { %2343 = vmatmul.mubr.f32.vlgmr.msra.gmra.mxu0 %v1249_v16  ;;  %2349 = vmatprep.subr.mxu1 %v1738_v17 }
 0x2f7   : > { %2350 = vmatpush3.msra.mxu1 %v1738_v17 }
 0x2f8   : > { %2351 = vmatprep.subr.mxu1 %v1737_v18 }
 0x2f9   : > { %2352 = vmatpush3.msra.mxu1 %v1737_v18 }
 0x2fa   : > { %2353 = vmatprep.subr.mxu1 %v1736_v19 }
 0x2fb   : > { %2354 = vmatpush3.msra.mxu1 %v1736_v19 }
 0x2fc   : > { %2355 = vmatprep.subr.mxu1 %v1735_v20 }
 0x2fd   : > { %2356 = vmatpush3.msra.mxu1 %v1735_v20 }
 0x2fe   : > { %2357 = vmatprep.subr.mxu1 %v1734_v21 }
 0x2ff   : > { %2358 = vmatpush3.msra.mxu1 %v1734_v21 }
 0x300   : > { %2359 = vmatprep.subr.mxu1 %v1733_v22 }
 0x301   : > { %2360 = vmatpush3.msra.mxu1 %v1733_v22 }
 0x302   : > { %2361 = vmatprep.subr.mxu1 %v1732_v23 }
 0x303   : > { %2362 = vmatpush3.msra.mxu1 %v1732_v23 }
 0x304   : > { %2363 = vmatprep.subr.mxu1 %v1731_v24 }
 0x305   : > { %2364 = vmatpush3.msra.mxu1 %v1731_v24 }
 0x306   : > { %2365 = vmatprep.subr.mxu1 %v1730_v25 }
 0x307   : > { %2366 = vmatpush3.msra.mxu1 %v1730_v25 }
 0x308   : > { %2367 = vmatprep.subr.mxu1 %v1729_v26 }
 0x309   : > { %2368 = vmatpush3.msra.mxu1 %v1729_v26 }
 0x30a   : > { %2369 = vmatprep.subr.mxu1 %v1728_v27 }
 0x30b   : > { %2370 = vmatpush3.msra.mxu1 %v1728_v27 }
 0x30c   : > { %2371 = vmatprep.subr.mxu1 %v1727_v28 }
 0x30d   : > { %2372 = vmatpush3.msra.mxu1 %v1727_v28 }
 0x30e   : > { %2373 = vmatprep.subr.mxu1 %v1726_v30 }
 0x30f   : > { %2374 = vmatpush3.msra.mxu1 %v1726_v30 }
 0x310   : > { %2375 = vmatprep.subr.mxu1 %v1725_v31 }
 0x311   : > { %2376 = vmatpush3.msra.mxu1 %v1725_v31 }
 0x312   : > { %2378 = vmatmul.mubr.f32.vlgmr.msra.gmra.mxu1 %v1437_v32 }
 0x3b2   : > { %v2309_v33 = vpop.f32.mrf.mxu1 }
 0x3b4   : > { %v1350_v36 = vpop.f32.mrf.mxu1 }
 0x3b6   : > { %v2344_v34 = vpop.f32.mrf.mxu0 }
 0x3b7   : > { %v1431_v38 = vadd.f32 %v2344_v34, %v2309_v33 }
 0x3b8   : > { %v1425_v37 = vpop.f32.mrf.mxu0 }
 0x3b9   : > { %v1426_v40 = vadd.f32 %v1425_v37, %v1350_v36 }
 0x3d2   : > { %v2379_v39 = vpop.f32.mrf.mxu1 }
 0x3d3   : > { %v1531_v41 = vadd.f32 %v2379_v39, %v1431_v38 }
 0x3d4   : > { %v1521_v42 = vpop.f32.mrf.mxu1 }
 0x3d5   : > { %v1530_v44 = vadd.f32 %v1521_v42, %v1426_v40  ;;  %v1540_v46 = vadd.f32 %v1741_v43, %v1531_v41 }
 0x3d7   : > { %v1539_v29 = vadd.f32 %v1741_v43, %v1530_v44  ;;  %1542 = vst [vmem:[%s334_s29 + $0x8] sm:$0xff] %v1540_v46 }
 0x3d9   : > { %1541 = vst [vmem:[%s334_s29] sm:$0xff] %v1539_v29 }
 0x3da PF: > { %s19_s30 = sadd.s32 1, %s2394_s30  }
 0x3db   : > { %p16_p4 = scmp.ge.s32.totalorder %s19_s30, 4  }
 0x3dd   :  { %18 = sbr.rel (!%p16_p4) target bundleno = 1 (0x1), region = 94 }

</bundles_post_ra>
